<compile_context>
chip_gen: v6e
topology: v6e:2x2x1
jax: 0.10.0
libtpu: 0.0.40
codegen_flags: <defaults>
</compile_context>

<pallas_src>
import functools

import jax
import jax.numpy as jnp
from jax import lax
from jax.experimental import pallas as pl
from jax.experimental.pallas import tpu as pltpu


def basic_block_kernel(xs_ref, sc_ref, w1_ref, b1_ref, w2_ref, b2_ref,
                       mask_ref, out_ref, h1_stk, *, taps, soff, base):
    """Fused BasicBlock, single invocation.

    xs_ref   : (9*C, LOUT) bf16   conv1 im2col operand (tap-major row blocks)
    sc_ref   : (C,  LOUT)  f32    identity shortcut (x at interior offset)
    w1_ref   : (C, 9*C)    bf16   conv1 weights, BN1 scale folded, tap-major
    b1_ref   : (C, 1)      f32    folded BN1 bias
    w2_ref   : (C, 9*C)    bf16   conv2 weights, BN2 scale folded, tap-major
    b2_ref   : (C, 1)      f32    folded BN2 bias
    mask_ref : (1, LOUT)   f32    1.0 on valid flat positions, 0 on halo / pad
    out_ref  : (C, LOUT)   f32    flat output; wrapper slices [:, :L]
    h1_stk   : (9*C, LSTK) f32    scratch for the conv2 stacked operand
    taps     : static tuple of 9 flat offsets kh*(W+2)+kw
    soff     : static flat offset of (1,1) inside a padded image = (W+2)+1
    base     : static 128-aligned column of output position 0 inside h1_stk
    """
    c, l_out = out_ref.shape

    # ---- conv1 (+ folded BN1 scale): ONE (C,9C) x (9C,LOUT) MXU matmul ----
    h1 = jnp.dot(w1_ref[...], xs_ref[...], preferred_element_type=jnp.float32)
    # BN1 bias + ReLU, then zero halo / cross-image / tail-pad positions.
    h1 = jnp.maximum(h1 + b1_ref[...], 0.0) * mask_ref[...]

    # ---- build the conv2 stacked operand -------------------------------
    # h1_stk[t*C + i, base + q] must equal the zero-padded conv1 activation at
    # flat position q + taps[t].  Zero only the small left halo strip, then do
    # 9 shifted full-width writes; columns past L are zero thanks to the mask.
    h1_stk[:, base:base + soff] = jnp.zeros((h1_stk.shape[0], soff),
                                            jnp.float32)
    for t, d in enumerate(taps):
        s = base + soff - d
        h1_stk[t * c:(t + 1) * c, s:s + l_out] = h1

    # ---- conv2 (+ folded BN2 scale): one matmul, aligned operand read ----
    acc2 = jnp.dot(w2_ref[...],
                   h1_stk[:, base:base + l_out].astype(jnp.bfloat16),
                   preferred_element_type=jnp.float32)

    # BN2 bias + identity shortcut (exact f32) + final ReLU; lane-dense store.
    out_ref[...] = jnp.maximum(acc2 + b2_ref[...] + sc_ref[...], 0.0)


def prepare_params(w1_oihw, bn1, w2_oihw, bn2, x_shape, eps=1e-5):
    """One-time (inference) prep: fold eval-mode BN scale into the conv
    weights, pack the weights tap-major as (C, 9*C) bf16, reshape biases, and
    build the flat validity mask for the given input shape."""
    N, C, H, W = x_shape
    assert w1_oihw.shape == (C, C, 3, 3), w1_oihw.shape
    assert w2_oihw.shape == (C, C, 3, 3), w2_oihw.shape
    HP, WP = H + 2, W + 2
    L = N * HP * WP
    LOUT = ((L + 127) // 128) * 128

    def fold(bn):
        gamma, beta, mean, var = bn
        scale = gamma / jnp.sqrt(var + eps)
        return scale, beta - mean * scale

    def pack(w, scale):
        w = w * scale[:, None, None, None]                 # fold BN scale on O
        # OIHW -> (O, kh, kw, I) -> (O, 9*I); row block t = kh*3 + kw.
        return (jnp.transpose(w, (0, 2, 3, 1))
                .reshape(C, 9 * C).astype(jnp.bfloat16))

    s1, b1 = fold(bn1)
    s2, b2 = fold(bn2)

    # Validity mask over flat positions: 1.0 where (h < H and w < W) inside the
    # per-image (H+2)x(W+2) frame, 0.0 on halo positions and on the tail pad.
    q = jnp.arange(L)
    ql = q % (HP * WP)
    valid = ((ql // WP) < H) & ((ql % WP) < W)
    mask = jnp.pad(valid.astype(jnp.float32), (0, LOUT - L)).reshape(1, LOUT)

    return dict(w1=pack(w1_oihw, s1), b1=b1.reshape(C, 1),
                w2=pack(w2_oihw, s2), b2=b2.reshape(C, 1), mask=mask)


def basic_block_pallas(x_nchw, params):
    """x_nchw: (N, C, H, W) float32.  Returns (N, C, H, W) float32."""
    N, C, H, W = x_nchw.shape
    HP, WP = H + 2, W + 2
    L = N * HP * WP                                  # flat padded-spatial len
    soff = WP + 1                                    # interior offset (1,1)
    taps = tuple(kh * WP + kw for kh in range(3) for kw in range(3))
    assert taps[4] == soff
    LOUT = ((L + 127) // 128) * 128                  # lane-dense output width
    base = ((soff + 127) // 128) * 128               # 128-aligned scratch base
    LSTK = ((base + soff + LOUT + 127) // 128) * 128  # scratch width

    # Layout plumbing + conv1 im2col (XLA side): NCHW -> (C, flat padded HW),
    # then stack the 9 tap-shifted views tap-major as (9*C, LOUT).
    x_cn = jnp.transpose(x_nchw, (1, 0, 2, 3))                        # (C,N,H,W)
    x_pad = jnp.pad(x_cn, ((0, 0), (0, 0), (1, 1), (1, 1))).reshape(C, L)
    x_ext = jnp.pad(x_pad, ((0, 0), (0, taps[-1])))                   # (C,L+2soff)
    blocks = [x_ext[:, d:d + L] for d in taps]
    x_stack = jnp.pad(jnp.concatenate(blocks, axis=0), ((0, 0), (0, LOUT - L)))
    shortcut = jnp.pad(blocks[4], ((0, 0), (0, LOUT - L)))            # d == soff
    x_stack = x_stack.astype(jnp.bfloat16)                            # MXU operand

    kernel = functools.partial(basic_block_kernel,
                               taps=taps, soff=soff, base=base)
    vmem = pl.BlockSpec(memory_space=pltpu.MemorySpace.VMEM)

    bytes_accessed = (x_stack.size * 2 + shortcut.size * 4
                      + 2 * (C * 9 * C) * 2 + 2 * C * 4
                      + LOUT * 4 + C * LOUT * 4)
    out_flat = pl.pallas_call(
        kernel,
        out_shape=jax.ShapeDtypeStruct((C, LOUT), jnp.float32),
        in_specs=[vmem] * 7,
        out_specs=vmem,
        scratch_shapes=[pltpu.VMEM((9 * C, LSTK), jnp.float32)],
        cost_estimate=pl.CostEstimate(flops=2 * 2 * C * (9 * C) * LOUT,
                                      transcendentals=0,
                                      bytes_accessed=bytes_accessed),
    )(x_stack, shortcut, params["w1"], params["b1"],
      params["w2"], params["b2"], params["mask"])

    # (C, LOUT) -> (C, L) -> (C, N, HP, WP) -> interior -> NCHW.
    y = out_flat[:, :L].reshape(C, N, HP, WP)[:, :, :H, :W]
    return jnp.transpose(y, (1, 0, 2, 3))


def basic_block_reference(x_nchw, w1_oihw, bn1, w2_oihw, bn2, eps=1e-5):
    """Pure-JAX f32 reference (eval-mode BN), for correctness checking."""
    x = jnp.transpose(x_nchw, (0, 2, 3, 1))  # NHWC
    w1 = jnp.transpose(w1_oihw, (2, 3, 1, 0))
    w2 = jnp.transpose(w2_oihw, (2, 3, 1, 0))
    dn = lax.conv_dimension_numbers(x.shape, w1.shape, ("NHWC", "HWIO", "NHWC"))

    def bn_apply(y, bn):
        gamma, beta, mean, var = bn
        scale = gamma / jnp.sqrt(var + eps)
        bias = beta - mean * scale
        return y * scale + bias

    y = lax.conv_general_dilated(x, w1, (1, 1), "SAME", dimension_numbers=dn)
    y = jnp.maximum(bn_apply(y, bn1), 0.0)
    z = lax.conv_general_dilated(y, w2, (1, 1), "SAME", dimension_numbers=dn)
    z = bn_apply(z, bn2)
    out = jnp.maximum(z + x, 0.0)
    return jnp.transpose(out, (0, 3, 1, 2))


if __name__ == "__main__":
    # BasicBlock(in_planes=4, planes=4, stride=1) -> identity shortcut.
    N, C, H, W = 2, 4, 16, 16

    key = jax.random.PRNGKey(0)
    keys = jax.random.split(key, 11)

    x = jax.random.normal(keys[0], (N, C, H, W), jnp.float32)

    # Deterministic synthetic parameters (shapes per the module __init__).
    w1 = jax.random.normal(keys[1], (C, C, 3, 3), jnp.float32) * 0.1  # conv1 OIHW
    w2 = jax.random.normal(keys[2], (C, C, 3, 3), jnp.float32) * 0.1  # conv2 OIHW

    bn1 = (
        jax.random.uniform(keys[3], (C,), jnp.float32, 0.5, 1.5),   # gamma
        jax.random.normal(keys[4], (C,), jnp.float32) * 0.1,        # beta
        jax.random.normal(keys[5], (C,), jnp.float32) * 0.1,        # running_mean
        jax.random.uniform(keys[6], (C,), jnp.float32, 0.5, 1.5),   # running_var
    )
    bn2 = (
        jax.random.uniform(keys[7], (C,), jnp.float32, 0.5, 1.5),
        jax.random.normal(keys[8], (C,), jnp.float32) * 0.1,
        jax.random.normal(keys[9], (C,), jnp.float32) * 0.1,
        jax.random.uniform(keys[10], (C,), jnp.float32, 0.5, 1.5),
    )

    # One-time parameter prep (BN fold, weight packing, mask), then jitted fwd.
    params = prepare_params(w1, bn1, w2, bn2, x.shape)
    fwd = jax.jit(basic_block_pallas)

    out = jax.block_until_ready(fwd(x, params))
    ref = jax.block_until_ready(basic_block_reference(x, w1, bn1, w2, bn2))

    assert out.shape == (N, C, H, W), out.shape
    # Tolerance relaxed from 1e-4 because MXU operands are bf16 (per review).
    assert jnp.allclose(out, ref, atol=5e-2, rtol=5e-2), (
        float(jnp.max(jnp.abs(out - ref))))

    print("KERNEL_OK")
</pallas_src>

<mosaic_0001>
module attributes {stable_mosaic.version = 11 : i64} {
  func.func @basic_block_kernel(%arg0: memref<36x768xbf16, #tpu.memory_space<vmem>>, %arg1: memref<4x768xf32, #tpu.memory_space<vmem>>, %arg2: memref<4x36xbf16, #tpu.memory_space<vmem>>, %arg3: memref<4x1xf32, #tpu.memory_space<vmem>>, %arg4: memref<4x36xbf16, #tpu.memory_space<vmem>>, %arg5: memref<4x1xf32, #tpu.memory_space<vmem>>, %arg6: memref<1x768xf32, #tpu.memory_space<vmem>>, %arg7: memref<4x768xf32, #tpu.memory_space<vmem>>, %arg8: memref<36x1024xf32, #tpu.memory_space<vmem>>) attributes {dimension_semantics = [], scalar_prefetch = 0 : i64, scratch_operands = 1 : i64, tpu.core_type = #tpu.core_type<tc>} {
    %c0 = arith.constant 0 : index
    %c0_0 = arith.constant 0 : index
    %0 = vector.load %arg2[%c0, %c0_0] : memref<4x36xbf16, #tpu.memory_space<vmem>>, vector<4x36xbf16>
    %c0_1 = arith.constant 0 : index
    %c0_2 = arith.constant 0 : index
    %1 = vector.load %arg0[%c0_1, %c0_2] : memref<36x768xbf16, #tpu.memory_space<vmem>>, vector<36x768xbf16>
    %cst = arith.constant dense<0.000000e+00> : vector<4x768xf32>
    %2 = tpu.matmul %0, %1, %cst {dimension_numbers = #tpu.dot_dimension_numbers<[1], [0], [0], [1], [0, 0, 1, 1], [], []>} : vector<4x36xbf16>, vector<36x768xbf16>, vector<4x768xf32> -> vector<4x768xf32>
    %c0_3 = arith.constant 0 : index
    %c0_4 = arith.constant 0 : index
    %3 = vector.load %arg3[%c0_3, %c0_4] : memref<4x1xf32, #tpu.memory_space<vmem>>, vector<4x1xf32>
    %4 = vector.broadcast %3 : vector<4x1xf32> to vector<4x768xf32>
    %5 = arith.addf %2, %4 : vector<4x768xf32>
    %cst_5 = arith.constant 0.000000e+00 : f32
    %6 = vector.broadcast %cst_5 : f32 to vector<4x768xf32>
    %7 = arith.maximumf %5, %6 : vector<4x768xf32>
    %c0_6 = arith.constant 0 : index
    %c0_7 = arith.constant 0 : index
    %8 = vector.load %arg6[%c0_6, %c0_7] : memref<1x768xf32, #tpu.memory_space<vmem>>, vector<1x768xf32>
    %9 = vector.broadcast %8 : vector<1x768xf32> to vector<4x768xf32>
    %10 = arith.mulf %7, %9 : vector<4x768xf32>
    %cst_8 = arith.constant 0.000000e+00 : f32
    %11 = vector.broadcast %cst_8 : f32 to vector<36x19xf32>
    %c0_9 = arith.constant 0 : index
    %c128 = arith.constant 128 : index
    %12 = vector.load %arg8[%c0_9, %c128] : memref<36x1024xf32, #tpu.memory_space<vmem>>, vector<36x19xf32>
    tpu.vector_store %arg8[%c0_9, %c128], %11 {strides = array<i32>} : memref<36x1024xf32, #tpu.memory_space<vmem>>, vector<36x19xf32>,
    %c0_10 = arith.constant 0 : index
    %c147 = arith.constant 147 : index
    %13 = vector.load %arg8[%c0_10, %c147] : memref<36x1024xf32, #tpu.memory_space<vmem>>, vector<4x768xf32>
    tpu.vector_store %arg8[%c0_10, %c147], %10 {strides = array<i32>} : memref<36x1024xf32, #tpu.memory_space<vmem>>, vector<4x768xf32>,
    %c4 = arith.constant 4 : index
    %c146 = arith.constant 146 : index
    %14 = vector.load %arg8[%c4, %c146] : memref<36x1024xf32, #tpu.memory_space<vmem>>, vector<4x768xf32>
    tpu.vector_store %arg8[%c4, %c146], %10 {strides = array<i32>} : memref<36x1024xf32, #tpu.memory_space<vmem>>, vector<4x768xf32>,
    %c8 = arith.constant 8 : index
    %c145 = arith.constant 145 : index
    %15 = vector.load %arg8[%c8, %c145] : memref<36x1024xf32, #tpu.memory_space<vmem>>, vector<4x768xf32>
    tpu.vector_store %arg8[%c8, %c145], %10 {strides = array<i32>} : memref<36x1024xf32, #tpu.memory_space<vmem>>, vector<4x768xf32>,
    %c12 = arith.constant 12 : index
    %c129 = arith.constant 129 : index
    %16 = vector.load %arg8[%c12, %c129] : memref<36x1024xf32, #tpu.memory_space<vmem>>, vector<4x768xf32>
    tpu.vector_store %arg8[%c12, %c129], %10 {strides = array<i32>} : memref<36x1024xf32, #tpu.memory_space<vmem>>, vector<4x768xf32>,
    %c16 = arith.constant 16 : index
    %c128_11 = arith.constant 128 : index
    %17 = vector.load %arg8[%c16, %c128_11] : memref<36x1024xf32, #tpu.memory_space<vmem>>, vector<4x768xf32>
    tpu.vector_store %arg8[%c16, %c128_11], %10 {strides = array<i32>} : memref<36x1024xf32, #tpu.memory_space<vmem>>, vector<4x768xf32>,
    %c20 = arith.constant 20 : index
    %c127 = arith.constant 127 : index
    %18 = vector.load %arg8[%c20, %c127] : memref<36x1024xf32, #tpu.memory_space<vmem>>, vector<4x768xf32>
    tpu.vector_store %arg8[%c20, %c127], %10 {strides = array<i32>} : memref<36x1024xf32, #tpu.memory_space<vmem>>, vector<4x768xf32>,
    %c24 = arith.constant 24 : index
    %c111 = arith.constant 111 : index
    %19 = vector.load %arg8[%c24, %c111] : memref<36x1024xf32, #tpu.memory_space<vmem>>, vector<4x768xf32>
    tpu.vector_store %arg8[%c24, %c111], %10 {strides = array<i32>} : memref<36x1024xf32, #tpu.memory_space<vmem>>, vector<4x768xf32>,
    %c28 = arith.constant 28 : index
    %c110 = arith.constant 110 : index
    %20 = vector.load %arg8[%c28, %c110] : memref<36x1024xf32, #tpu.memory_space<vmem>>, vector<4x768xf32>
    tpu.vector_store %arg8[%c28, %c110], %10 {strides = array<i32>} : memref<36x1024xf32, #tpu.memory_space<vmem>>, vector<4x768xf32>,
    %c32 = arith.constant 32 : index
    %c109 = arith.constant 109 : index
    %21 = vector.load %arg8[%c32, %c109] : memref<36x1024xf32, #tpu.memory_space<vmem>>, vector<4x768xf32>
    tpu.vector_store %arg8[%c32, %c109], %10 {strides = array<i32>} : memref<36x1024xf32, #tpu.memory_space<vmem>>, vector<4x768xf32>,
    %c0_12 = arith.constant 0 : index
    %c0_13 = arith.constant 0 : index
    %22 = vector.load %arg4[%c0_12, %c0_13] : memref<4x36xbf16, #tpu.memory_space<vmem>>, vector<4x36xbf16>
    %c0_14 = arith.constant 0 : index
    %c128_15 = arith.constant 128 : index
    %23 = vector.load %arg8[%c0_14, %c128_15] : memref<36x1024xf32, #tpu.memory_space<vmem>>, vector<36x768xf32>
    %24 = arith.truncf %23 : vector<36x768xf32> to vector<36x768xbf16>
    %cst_16 = arith.constant dense<0.000000e+00> : vector<4x768xf32>
    %25 = tpu.matmul %22, %24, %cst_16 {dimension_numbers = #tpu.dot_dimension_numbers<[1], [0], [0], [1], [0, 0, 1, 1], [], []>} : vector<4x36xbf16>, vector<36x768xbf16>, vector<4x768xf32> -> vector<4x768xf32>
    %c0_17 = arith.constant 0 : index
    %c0_18 = arith.constant 0 : index
    %26 = vector.load %arg5[%c0_17, %c0_18] : memref<4x1xf32, #tpu.memory_space<vmem>>, vector<4x1xf32>
    %27 = vector.broadcast %26 : vector<4x1xf32> to vector<4x768xf32>
    %28 = arith.addf %25, %27 : vector<4x768xf32>
    %c0_19 = arith.constant 0 : index
    %c0_20 = arith.constant 0 : index
    %29 = vector.load %arg1[%c0_19, %c0_20] : memref<4x768xf32, #tpu.memory_space<vmem>>, vector<4x768xf32>
    %30 = arith.addf %28, %29 : vector<4x768xf32>
    %cst_21 = arith.constant 0.000000e+00 : f32
    %31 = vector.broadcast %cst_21 : f32 to vector<4x768xf32>
    %32 = arith.maximumf %30, %31 : vector<4x768xf32>
    %c0_22 = arith.constant 0 : index
    %c0_23 = arith.constant 0 : index
    %33 = vector.load %arg7[%c0_22, %c0_23] : memref<4x768xf32, #tpu.memory_space<vmem>>, vector<4x768xf32>
    tpu.vector_store %arg7[%c0_22, %c0_23], %32 {strides = array<i32>} : memref<4x768xf32, #tpu.memory_space<vmem>>, vector<4x768xf32>,
    return
  }
}

</mosaic_0001>

<bundles_post_ra>
// kernel: basic_block_pallas.1
= control target key start
LH: loop header
LB: loop body
LE: loop exit
PB: predicated region body
PF: predicated region fallthrough
CT: control target
= control target key end

     0   :  { %vm128_vm0 = vcmask 1041408   ;;  %v920_v2 = vmov 0   ;;  %vm124_vm1 = vcmask 293888   ;;  %vm314_vm2 = vcmask 154624   ;;  %s923_s11 = smov 111   ;;  %s924_s12 = smov 127   ;;  %s1192_s0 = inlined_call_operand.vmem [shape: bf16[36,768], index: 0, kind: input, shape index: {}]   ;;  %s1193_s3 = inlined_call_operand.vmem [shape: f32[4,1], index: 3, kind: input, shape index: {}]   ;;  %s1194_s2 = inlined_call_operand.vmem [shape: bf16[4,36], index: 2, kind: input, shape index: {}]   ;;  %s1195_s6 = inlined_call_operand.vmem [shape: f32[1,768], index: 6, kind: input, shape index: {}]   ;;  %s1196_s5 = inlined_call_operand.vmem [shape: f32[4,1], index: 5, kind: input, shape index: {}]   ;;  %s1197_s4 = inlined_call_operand.vmem [shape: bf16[4,36], index: 4, kind: input, shape index: {}]   ;;  %s1198_s1 = inlined_call_operand.vmem [shape: f32[4,768], index: 1, kind: input, shape index: {}]   ;;  %s1199_s7 = inlined_call_operand.vmem [shape: f32[4,768], index: 7, kind: output, shape index: {}]  }
   0x1   :  { %v40_v0 = vld [vmem:[%s1192_s0 + $0x60] sm:$0x33]  ;;  %v41_v1 = vld [vmem:[%s1192_s0 + $0x68] sm:$0x33]  ;;  %179 = vmatprep.mubr.bf16.mxu0 %v920_v2  ;;  %220 = vmatprep.mubr.bf16.mxu1 %v920_v2  ;;  %v899_v8 = vld [vmem:[%s1192_s0 + $0x3c] ss:$24 sps:$4 sm:$0xff]   ;;  %v278_v28 = vlaneseq }
   0x2   :  { %v864_v3 = vcombine.high %v40_v0, %v40_v0  ;;  %v866_v4 = vcombine.high %v41_v1, %v41_v1  ;;  %v863_v5 = vcombine.low %v40_v0, %v40_v0  ;;  %v865_v6 = vcombine.low %v41_v1, %v41_v1  ;;  %v897_v7 = vld [vmem:[%s1192_s0 + $0x34] ss:$24 sps:$4 sm:$0xff]   ;;  %891 = vset.pattern.permute.xlu0 %v920_v2  ;;  %v901_v11 = vld [vmem:[%s1192_s0 + $0x30] ss:$24 sps:$4 sm:$0xff]   ;;  %v903_v13 = vld [vmem:[%s1192_s0 + $0x4] ss:$24 sps:$4 sm:$0xff]  }
   0x3   :  { %892 = vset.pattern.permute.xlu1 %v920_v2  ;;  %v902_v12 = vld [vmem:[%s1192_s0 + $0x38] ss:$24 sps:$4 sm:$0xff]   ;;  %v905_v14 = vld [vmem:[%s1192_s0 + $0xc] ss:$24 sps:$4 sm:$0xff]   ;;  %v908_v17 = vld [vmem:[%s1192_s0 + $0x8] ss:$24 sps:$4 sm:$0xff]  }
   0x4   :  { %869 = vmatprep.subr.msk.bf16.mxu0 %vm128_vm0, %v864_v3  ;;  %871 = vmatprep.subr.msk.bf16.mxu1 %vm128_vm0, %v866_v4  ;;  %v130_v9 = vsel %vm128_vm0, %v863_v5, 0  ;;  %v136_v10 = vsel %vm128_vm0, %v865_v6, 0  ;;  %v42_v15 = vld [vmem:[%s1192_s0 + $0x70] sm:$0x33]  ;;  %v907_v16 = vld [vmem:[%s1192_s0] ss:$24 sps:$4 sm:$0xff]  }
   0x5   :  { %158 = vmatpush1.bf16.msra.mxu0 %v130_v9  ;;  %199 = vmatpush1.bf16.msra.mxu1 %v136_v10  ;;  %v868_v18 = vcombine.high %v42_v15, %v42_v15  ;;  %v867_v19 = vcombine.low %v42_v15, %v42_v15  ;;  %v43_v20 = vld [vmem:[%s1193_s3] sm:$0xf]  ;;  %v913_v23 = vld [vmem:[%s1192_s0 + $0x44] ss:$24 sps:$4 sm:$0xff]   ;;  %v916_v25 = vld [vmem:[%s1192_s0 + $0x14] ss:$24 sps:$4 sm:$0xff]  }
   0x6   :  { %159 = vmatprep.subr.bf16.mxu0 %v897_v7  ;;  %200 = vmatprep.subr.bf16.mxu1 %v899_v8  ;;  %v27_v21 = vld [vmem:[%s1194_s2] sm:$0x3]  ;;  %v914_v26 = vld [vmem:[%s1192_s0 + $0x10] ss:$24 sps:$4 sm:$0xff]   ;;  %v921_v27 = vmov 0.0   ;;  %v279_v29 = vshrl.u32 %v278_v28, 7 }
   0x7   :  { %46 = vperm.xlu0 %891, %v43_v20   ;;  %v142_v22 = vsel %vm128_vm0, %v867_v19, 0  ;;  %v911_v24 = vld [vmem:[%s1192_s0 + $0x40] ss:$24 sps:$4 sm:$0xff]   ;;  %318 = vst.msk [vmem:[#allocation2 + $0xc8] sm:$0xff] %vm314_vm2, %v921_v27  ;;  %315 = vst.msk [vmem:[#allocation2 + $0x8] sm:$0xff] %vm314_vm2, %v921_v27  ;;  %s925_s13 = smov 19  }
   0x8   :  { %316 = vst.msk [vmem:[#allocation2 + $0x48] sm:$0xff] %vm314_vm2, %v921_v27  ;;  %317 = vst.msk [vmem:[#allocation2 + $0x88] sm:$0xff] %vm314_vm2, %v921_v27  ;;  %v280_v30 = vsub.s32 0, %v279_v29  ;;  %v288_v31 = vsub.s32 2, %v279_v29  ;;  %v276_v33 = vld [vmem:[%s1195_s6] sm:$0x3f] }
   0x9   :  { %160 = vmatpush1.bf16.msra.mxu0 %v901_v11  ;;  %201 = vmatpush1.bf16.msra.mxu1 %v902_v12  ;;  %v284_v34 = vsub.s32 1, %v279_v29  ;;  %v292_v35 = vsub.s32 3, %v279_v29  ;;  %s922_s6 = smov 109   ;;  %v296_v60 = vsub.s32 4, %v279_v29  ;;  %v300_v61 = vsub.s32 5, %v279_v29  ;;  %s926_s14 = smov 110  }
   0xa   :  { %161 = vmatprep.subr.bf16.mxu0 %v903_v13  ;;  %202 = vmatprep.subr.bf16.mxu1 %v905_v14  ;;  %v281_v39 = vrot.slane %v276_v33, %v280_v30  ;;  %v289_v41 = vrot.slane %v276_v33, %v288_v31  ;;  %vm319_vm3 = vcmask 150528   ;;  %s927_s15 = smov 17   ;;  %s928_s16 = smov 18   ;;  %vm519_vm4 = vcmask 908288  }
   0xb   :  { %v285_v43 = vrot.slane %v276_v33, %v284_v34  ;;  %v293_v45 = vrot.slane %v276_v33, %v292_v35  ;;  %v297_v0 = vrot.slane %v276_v33, %v296_v60  ;;  %v301_v6 = vrot.slane %v276_v33, %v300_v61  ;;  %320 = vst.msk [vmem:[#allocation2 + $0x108] sm:$0xf] %vm319_vm3, %v921_v27  ;;  %s929_s17 = smov 1  }
   0xc   :  { %vm351_vm5 = vcmask 1043608   ;;  %vm424_vm6 = vcmask 1043592   ;;  %vm411_vm7 = vcmask 138240   ;;  %vm587_vm8 = vcmask 891904  }
   0xd   :  { %162 = vmatpush1.bf16.msra.mxu0 %v907_v16  ;;  %203 = vmatpush1.bf16.msra.mxu1 %v908_v17  ;;  %v658_v17 = vld [vmem:[%s1196_s5] sm:$0xf]  ;;  %vm485_vm9 = vcmask 1039360   ;;  %vm390_vm10 = vcmask 1047700   ;;  %vm553_vm11 = vcmask 900096   ;;  %vm458_vm12 = vcmask 1047564  }
   0xe   :  { %873 = vmatprep.subr.msk.bf16.mxu0 %vm128_vm0, %v868_v18  ;;  %vm377_vm13 = vcmask 146432   ;;  %vm445_vm14 = vcmask 7168   ;;  %vm607_vm15 = vcmask 887808   ;;  %vm505_vm3 = vcmask 1039364  }
  0x10   :  { %870 = vmatmul.mubr.msk.bf16.vlgmr.msra.gmra.mxu0 %vm124_vm1, %v27_v21  ;;  %872 = vmatmul.mubr.msk.bf16.vlgmr.msra.gmra.mxu1 %vm124_vm1, %v27_v21 }
  0x11   :  { %240 = vmatpush1.bf16.msra.mxu0 %v142_v22  ;;  %261 = vmatprep.mubr.bf16.mxu0 %v920_v2 }
  0x12   :  { %241 = vmatprep.subr.bf16.mxu0 %v913_v23  ;;  %717 = vmatprep.mubr.bf16.mxu1 %v920_v2 }
  0x15   :  { %242 = vmatpush1.bf16.msra.mxu0 %v911_v24 }
  0x16   :  { %243 = vmatprep.subr.bf16.mxu0 %v916_v25 }
  0x19   :  { %244 = vmatpush1.bf16.msra.mxu0 %v914_v26 }
  0x1c   :  { %874 = vmatmul.mubr.msk.bf16.vlgmr.msra.gmra.mxu0 %vm124_vm1, %v27_v21 }
  0x1d   :  { %758 = vmatprep.mubr.bf16.mxu0 %v920_v2 }
  0x82   :  { %v47_v32 = vpop.permute.xlu0 %46 }
  0xd0   :  { %v181_v36 = vpop.f32.mrf.mxu0  ;;  %v222_v37 = vpop.f32.mrf.mxu1 }
  0xd1   :  { %v182_v38 = vadd.f32 %v181_v36, %v47_v32  ;;  %v223_v40 = vadd.f32 %v222_v37, %v47_v32 }
  0xd2   :  { %v183_v42 = vpop.f32.mrf.mxu0  ;;  %v224_v44 = vpop.f32.mrf.mxu1 }
  0xd3   :  { %v270_v46 = vmax.f32 %v182_v38, 0.0  ;;  %v272_v47 = vmax.f32 %v223_v40, 0.0  ;;  %v184_v48 = vadd.f32 %v183_v42, %v47_v32  ;;  %v225_v49 = vadd.f32 %v224_v44, %v47_v32 }
  0xd4   :  { %v185_v50 = vpop.f32.mrf.mxu0  ;;  %v226_v51 = vpop.f32.mrf.mxu1 }
  0xd5   :  { %v308_v52 = vmul.f32 %v281_v39, %v270_v46  ;;  %v310_v53 = vmul.f32 %v289_v41, %v272_v47  ;;  %v271_v54 = vmax.f32 %v184_v48, 0.0  ;;  %v273_v55 = vmax.f32 %v225_v49, 0.0 }
  0xd6   :  { %v186_v56 = vpop.f32.mrf.mxu0  ;;  %v227_v57 = vpop.f32.mrf.mxu1 }
  0xd7   :  { %469 = vst [vmem:[#allocation2 + $0x98] sm:$0xf] %v310_v53  ;;  %v309_v58 = vmul.f32 %v285_v43, %v271_v54  ;;  %v311_v59 = vmul.f32 %v293_v45, %v273_v55  ;;  %579 = vrot.lane.b32.xlu1 %v310_v53, %s922_s6  ;;  %575 = vrot.lane.b32.xlu0 %v308_v52, %s922_s6  ;;  %467 = vst [vmem:[#allocation2 + $0x88] sm:$0xf] %v308_v52  ;;  %v359_v1 = vrot.slane %v308_v52, 4 }
  0xd8   :  { %v361_v12 = vrot.slane %v310_v53, 4 }
  0xd9   :  { %468 = vst [vmem:[#allocation2 + $0x90] sm:$0xf] %v309_v58  ;;  %470 = vst [vmem:[#allocation2 + $0xa0] sm:$0xf] %v311_v59  ;;  %v360_v13 = vrot.slane %v309_v58, 4  ;;  %v362_v14 = vrot.slane %v311_v59, 4 }
  0xdb   :  { %511 = vrot.lane.b32.xlu1 %v310_v53, %s923_s11  ;;  %509 = vrot.lane.b32.xlu0 %v309_v58, %s923_s11 }
  0xdc   :  { %v263_v62 = vpop.f32.mrf.mxu0 }
  0xdd   :  { %v264_v63 = vadd.f32 %v263_v62, %v47_v32 }
  0xde   :  { %v265_v3 = vpop.f32.mrf.mxu0 }
  0xdf   :  { %v274_v4 = vmax.f32 %v264_v63, 0.0  ;;  %v266_v5 = vadd.f32 %v265_v3, %v47_v32  ;;  %507 = vrot.lane.b32.xlu1 %v308_v52, %s923_s11  ;;  %473 = vrot.lane.b32.xlu0 %v359_v1, %s924_s12 }
  0xe0   :  { %v267_v7 = vpop.f32.mrf.mxu0 }
  0xe1   :  { %v312_v8 = vmul.f32 %v297_v0, %v274_v4  ;;  %v275_v9 = vmax.f32 %v266_v5, 0.0 }
  0xe2   :  { %v268_v10 = vpop.f32.mrf.mxu0 }
  0xe3   :  { %471 = vst [vmem:[#allocation2 + $0xa8] sm:$0xf] %v312_v8  ;;  %v313_v11 = vmul.f32 %v301_v6, %v275_v9  ;;  %327 = vrot.lane.b32.xlu1 %v308_v52, %s925_s13  ;;  %541 = vrot.lane.b32.xlu0 %v359_v1, %s926_s14  ;;  %v363_v15 = vrot.slane %v312_v8, 4 }
  0xe5   :  { %472 = vst [vmem:[#allocation2 + $0xb0] sm:$0xf] %v313_v11  ;;  %v364_v16 = vrot.slane %v313_v11, 4 }
  0xe7   :  { %399 = vrot.lane.b32.xlu1 %v308_v52, %s927_s15  ;;  %329 = vrot.lane.b32.xlu0 %v309_v58, %s925_s13 }
  0xeb   :  { %331 = vrot.lane.b32.xlu1 %v310_v53, %s925_s13  ;;  %401 = vrot.lane.b32.xlu0 %v309_v58, %s927_s15 }
  0xef   :  { %403 = vrot.lane.b32.xlu1 %v310_v53, %s927_s15  ;;  %513 = vrot.lane.b32.xlu0 %v311_v59, %s923_s11 }
  0xf3   :  { %577 = vrot.lane.b32.xlu1 %v309_v58, %s922_s6  ;;  %333 = vrot.lane.b32.xlu0 %v311_v59, %s925_s13 }
  0xf7   :  { %477 = vrot.lane.b32.xlu1 %v361_v12, %s924_s12  ;;  %405 = vrot.lane.b32.xlu0 %v311_v59, %s927_s15 }
  0xfb   :  { %545 = vrot.lane.b32.xlu1 %v361_v12, %s926_s14  ;;  %475 = vrot.lane.b32.xlu0 %v360_v13, %s924_s12 }
  0xff   :  { %365 = vrot.lane.b32.xlu1 %v359_v1, %s928_s16  ;;  %543 = vrot.lane.b32.xlu0 %v360_v13, %s926_s14 }
 0x103   :  { %433 = vrot.lane.b32.xlu1 %v359_v1, %s929_s17  ;;  %367 = vrot.lane.b32.xlu0 %v360_v13, %s928_s16 }
 0x107   :  { %581 = vrot.lane.b32.xlu1 %v311_v59, %s922_s6  ;;  %435 = vrot.lane.b32.xlu0 %v360_v13, %s929_s17 }
 0x10b   :  { %369 = vrot.lane.b32.xlu1 %v361_v12, %s928_s16  ;;  %479 = vrot.lane.b32.xlu0 %v362_v14, %s924_s12 }
 0x10f   :  { %437 = vrot.lane.b32.xlu1 %v361_v12, %s929_s17  ;;  %547 = vrot.lane.b32.xlu0 %v362_v14, %s926_s14 }
 0x113   :  { %515 = vrot.lane.b32.xlu1 %v312_v8, %s923_s11  ;;  %371 = vrot.lane.b32.xlu0 %v362_v14, %s928_s16 }
 0x117   :  { %335 = vrot.lane.b32.xlu1 %v312_v8, %s925_s13  ;;  %439 = vrot.lane.b32.xlu0 %v362_v14, %s929_s17 }
 0x11b   :  { %407 = vrot.lane.b32.xlu1 %v312_v8, %s927_s15  ;;  %583 = vrot.lane.b32.xlu0 %v312_v8, %s922_s6 }
 0x11f   :  { %585 = vrot.lane.b32.xlu1 %v313_v11, %s922_s6  ;;  %337 = vrot.lane.b32.xlu0 %v313_v11, %s925_s13 }
 0x123   :  { %481 = vrot.lane.b32.xlu1 %v363_v15, %s924_s12  ;;  %409 = vrot.lane.b32.xlu0 %v313_v11, %s927_s15 }
 0x127   :  { %549 = vrot.lane.b32.xlu1 %v363_v15, %s926_s14  ;;  %483 = vrot.lane.b32.xlu0 %v364_v16, %s924_s12 }
 0x12b   :  { %517 = vrot.lane.b32.xlu1 %v313_v11, %s923_s11  ;;  %551 = vrot.lane.b32.xlu0 %v364_v16, %s926_s14 }
 0x12f   :  { %373 = vrot.lane.b32.xlu1 %v363_v15, %s928_s16  ;;  %375 = vrot.lane.b32.xlu0 %v364_v16, %s928_s16 }
 0x133   :  { %441 = vrot.lane.b32.xlu1 %v363_v15, %s929_s17  ;;  %443 = vrot.lane.b32.xlu0 %v364_v16, %s929_s17 }
 0x137   :  { %661 = vperm.xlu1 %892, %v658_v17  }
 0x149   :  { %v1088_v18 = vpop.permute.xlu1 %579  ;;  %v576_v19 = vpop.permute.xlu0 %575 }
 0x14d   :  { %v512_v20 = vpop.permute.xlu1 %511  ;;  %v510_v21 = vpop.permute.xlu0 %509 }
 0x14e   :  { %v521_v22 = vsel %vm519_vm4, %v510_v21, %v512_v20 }
 0x14f   :  { %535 = vst [vmem:[#allocation2 + $0xd0] sm:$0xf] %v521_v22 }
 0x151   :  { %v508_v23 = vpop.permute.xlu1 %507  ;;  %v474_v24 = vpop.permute.xlu0 %473 }
 0x152   :  { %v520_v25 = vsel %vm519_vm4, %v508_v23, %v510_v21 }
 0x153   :  { %534 = vst [vmem:[#allocation2 + $0xc8] sm:$0xf] %v520_v25 }
 0x155   :  { %v328_v26 = vpop.permute.xlu1 %327  ;;  %v542_v27 = vpop.permute.xlu0 %541 }
 0x156   :  { %352 = vst.msk [vmem:[#allocation2 + $0x8] sm:$0xf] %vm351_vm5, %v328_v26  ;;  %vm573_vm5 = vcmask 900100  }
 0x159   :  { %v400_v28 = vpop.permute.xlu1 %399  ;;  %v330_v29 = vpop.permute.xlu0 %329 }
 0x15a   :  { %425 = vst.msk [vmem:[#allocation2 + $0x48] sm:$0xf] %vm424_vm6, %v400_v28  ;;  %v339_v30 = vsel %vm314_vm2, %v328_v26, %v330_v29 }
 0x15b   :  { %353 = vst [vmem:[#allocation2 + $0x10] sm:$0xf] %v339_v30 }
 0x15d   :  { %v332_v31 = vpop.permute.xlu1 %331  ;;  %v402_v32 = vpop.permute.xlu0 %401 }
 0x15e   :  { %v340_v33 = vsel %vm314_vm2, %v330_v29, %v332_v31  ;;  %v412_v34 = vsel %vm411_vm7, %v400_v28, %v402_v32  ;;  %v1137_v28 = vld [vmem:[%s1197_s4] sm:$0x3] }
 0x15f   :  { %354 = vst [vmem:[#allocation2 + $0x18] sm:$0xf] %v340_v33  ;;  %426 = vst [vmem:[#allocation2 + $0x50] sm:$0xf] %v412_v34 }
 0x161   :  { %v404_v35 = vpop.permute.xlu1 %403  ;;  %v1095_v36 = vpop.permute.xlu0 %513 }
 0x162   :  { %v413_v37 = vsel %vm411_vm7, %v402_v32, %v404_v35  ;;  %v522_v38 = vsel %vm519_vm4, %v512_v20, %v1095_v36 }
 0x163   :  { %427 = vst [vmem:[#allocation2 + $0x58] sm:$0xf] %v413_v37  ;;  %536 = vst [vmem:[#allocation2 + $0xd8] sm:$0xf] %v522_v38 }
 0x165   :  { %v578_v39 = vpop.permute.xlu1 %577  ;;  %v1100_v40 = vpop.permute.xlu0 %333 }
 0x166   :  { %v588_v41 = vsel %vm587_vm8, %v576_v19, %v578_v39  ;;  %v589_v42 = vsel %vm587_vm8, %v578_v39, %v1088_v18  ;;  %v341_v43 = vsel %vm314_vm2, %v332_v31, %v1100_v40 }
 0x167   :  { %602 = vst [vmem:[#allocation2 + $0x108] sm:$0xf] %v588_v41  ;;  %603 = vst [vmem:[#allocation2 + $0x110] sm:$0xf] %v589_v42 }
 0x168   :  { %355 = vst [vmem:[#allocation2 + $0x20] sm:$0xf] %v341_v43 }
 0x169   :  { %v478_v44 = vpop.permute.xlu1 %477  ;;  %v1107_v45 = vpop.permute.xlu0 %405 }
 0x16a   :  { %v414_v46 = vsel %vm411_vm7, %v404_v35, %v1107_v45 }
 0x16b   :  { %428 = vst [vmem:[#allocation2 + $0x60] sm:$0xf] %v414_v46 }
 0x16d   :  { %v546_v47 = vpop.permute.xlu1 %545  ;;  %v476_v48 = vpop.permute.xlu0 %475 }
 0x16e   :  { %v486_v49 = vsel %vm485_vm9, %v474_v24, %v476_v48  ;;  %v487_v50 = vsel %vm485_vm9, %v476_v48, %v478_v44  ;;  %v635_v51 = vld [vmem:[#allocation2 + $0x110] sm:$0xf]  ;;  %v634_v52 = vld [vmem:[#allocation2 + $0x108] sm:$0xf] }
 0x16f   :  { %500 = vst [vmem:[#allocation2 + $0x88] sm:$0xf0] %v486_v49  ;;  %501 = vst [vmem:[#allocation2 + $0x90] sm:$0xf0] %v487_v50  ;;  %v653_v53 = vpack.c.bf16 %v635_v51, %v635_v51  ;;  %v652_v54 = vpack.c.bf16 %v634_v52, %v634_v52 }
 0x171   :  { %875 = vmatprep.subr.msk.bf16.mxu1 %vm128_vm0, %v653_v53  ;;  %v366_v55 = vpop.permute.xlu1 %365  ;;  %v544_v56 = vpop.permute.xlu0 %543  ;;  %v668_v57 = vsel %vm128_vm0, %v652_v54, 0 }
 0x172   :  { %391 = vst.msk [vmem:[#allocation2 + $0x8] sm:$0xf0] %vm390_vm10, %v366_v55  ;;  %v554_v58 = vsel %vm553_vm11, %v542_v27, %v544_v56  ;;  %v555_v59 = vsel %vm553_vm11, %v544_v56, %v546_v47  ;;  %696 = vmatpush1.bf16.msra.mxu1 %v668_v57 }
 0x173   :  { %568 = vst [vmem:[#allocation2 + $0xc8] sm:$0xf0] %v554_v58  ;;  %569 = vst [vmem:[#allocation2 + $0xd0] sm:$0xf0] %v555_v59 }
 0x175   :  { %v434_v60 = vpop.permute.xlu1 %433  ;;  %v368_v61 = vpop.permute.xlu0 %367 }
 0x176   :  { %459 = vst.msk [vmem:[#allocation2 + $0x48] sm:$0xf0] %vm458_vm12, %v434_v60  ;;  %v378_v62 = vsel %vm377_vm13, %v366_v55, %v368_v61  ;;  %v623_v1 = vld [vmem:[#allocation2 + $0x90] sm:$0xff]  ;;  %v622_v6 = vld [vmem:[#allocation2 + $0x88] sm:$0xff] }
 0x177   :  { %392 = vst [vmem:[#allocation2 + $0x10] sm:$0xf0] %v378_v62 }
 0x179   :  { %v582_v63 = vpop.permute.xlu1 %581  ;;  %v436_v0 = vpop.permute.xlu0 %435  ;;  %v610_v22 = vld [vmem:[#allocation2 + $0x8] sm:$0xff] }
 0x17a   :  { %v590_v3 = vsel %vm587_vm8, %v1088_v18, %v582_v63  ;;  %v446_v4 = vsel %vm445_vm14, %v434_v60, %v436_v0  ;;  %v629_v5 = vld [vmem:[#allocation2 + $0xd0] sm:$0xff]  ;;  %v628_v7 = vld [vmem:[#allocation2 + $0xc8] sm:$0xff] }
 0x17b   :  { %604 = vst [vmem:[#allocation2 + $0x118] sm:$0xf] %v590_v3  ;;  %460 = vst [vmem:[#allocation2 + $0x50] sm:$0xf0] %v446_v4  ;;  %v647_v8 = vpack.c.bf16 %v629_v5, %v623_v1  ;;  %v646_v9 = vpack.c.bf16 %v628_v7, %v622_v6 }
 0x17d   :  { %v370_v10 = vpop.permute.xlu1 %369  ;;  %697 = vmatprep.subr.bf16.mxu1 %v647_v8  ;;  %v480_v11 = vpop.permute.xlu0 %479  ;;  %v616_v16 = vld [vmem:[#allocation2 + $0x48] sm:$0xff] }
 0x17e   :  { %v379_v12 = vsel %vm377_vm13, %v368_v61, %v370_v10  ;;  %v488_v13 = vsel %vm485_vm9, %v478_v44, %v480_v11  ;;  %698 = vmatpush1.bf16.msra.mxu1 %v646_v9  ;;  %v611_v19 = vld [vmem:[#allocation2 + $0x10] sm:$0xff]  ;;  %v640_v23 = vpack.c.bf16 %v616_v16, %v610_v22 }
 0x17f   :  { %393 = vst [vmem:[#allocation2 + $0x18] sm:$0xf0] %v379_v12  ;;  %502 = vst [vmem:[#allocation2 + $0x98] sm:$0xf0] %v488_v13 }
 0x181   :  { %v438_v14 = vpop.permute.xlu1 %437  ;;  %v548_v15 = vpop.permute.xlu0 %547 }
 0x182   :  { %v447_v17 = vsel %vm445_vm14, %v436_v0, %v438_v14  ;;  %v556_v18 = vsel %vm553_vm11, %v546_v47, %v548_v15  ;;  %v617_v20 = vld [vmem:[#allocation2 + $0x50] sm:$0xff] }
 0x183   :  { %461 = vst [vmem:[#allocation2 + $0x58] sm:$0xf0] %v447_v17  ;;  %570 = vst [vmem:[#allocation2 + $0xd8] sm:$0xf0] %v556_v18  ;;  %v641_v21 = vpack.c.bf16 %v617_v20, %v611_v19 }
 0x185   :  { %v1125_v24 = vpop.permute.xlu1 %515  ;;  %699 = vmatprep.subr.bf16.mxu1 %v641_v21  ;;  %v1127_v25 = vpop.permute.xlu0 %371 }
 0x186   :  { %v523_v26 = vsel %vm519_vm4, %v1095_v36, %v1125_v24  ;;  %v380_v27 = vsel %vm377_vm13, %v370_v10, %v1127_v25  ;;  %700 = vmatpush1.bf16.msra.mxu1 %v640_v23  ;;  %v624_v8 = vld [vmem:[#allocation2 + $0x98] sm:$0xff] }
 0x187   :  { %537 = vst [vmem:[#allocation2 + $0xe0] sm:$0xf] %v523_v26  ;;  %394 = vst [vmem:[#allocation2 + $0x20] sm:$0xf0] %v380_v27  ;;  %v612_v23 = vld [vmem:[#allocation2 + $0x18] sm:$0xff] }
 0x189   :  { %v336_v29 = vpop.permute.xlu1 %335  ;;  %v1139_v30 = vpop.permute.xlu0 %439  ;;  %876 = vmatmul.mubr.msk.bf16.vlgmr.msra.gmra.mxu1 %vm124_vm1, %v1137_v28 }
 0x18a   :  { %v342_v31 = vsel %vm314_vm2, %v1100_v40, %v336_v29  ;;  %v448_v32 = vsel %vm445_vm14, %v438_v14, %v1139_v30  ;;  %799 = vmatprep.mubr.bf16.mxu1 %v920_v2  ;;  %v636_v2 = vld [vmem:[#allocation2 + $0x118] sm:$0xf] }
 0x18b   :  { %356 = vst [vmem:[#allocation2 + $0x28] sm:$0xf] %v342_v31  ;;  %462 = vst [vmem:[#allocation2 + $0x60] sm:$0xf0] %v448_v32  ;;  %v654_v43 = vpack.c.bf16 %v636_v2, %v636_v2  ;;  %v630_v0 = vld [vmem:[#allocation2 + $0xd8] sm:$0xff] }
 0x18c   :  { %v648_v9 = vpack.c.bf16 %v630_v0, %v624_v8  ;;  %v618_v16 = vld [vmem:[#allocation2 + $0x58] sm:$0xff] }
 0x18d   :  { %v408_v33 = vpop.permute.xlu1 %407  ;;  %v584_v34 = vpop.permute.xlu0 %583  ;;  %v674_v50 = vsel %vm128_vm0, %v654_v43, 0 }
 0x18e   :  { %v415_v35 = vsel %vm411_vm7, %v1107_v45, %v408_v33  ;;  %v591_v36 = vsel %vm587_vm8, %v582_v63, %v584_v34  ;;  %v613_v10 = vld [vmem:[#allocation2 + $0x20] sm:$0xff] }
 0x18f   :  { %429 = vst [vmem:[#allocation2 + $0x68] sm:$0xf] %v415_v35  ;;  %605 = vst [vmem:[#allocation2 + $0x120] sm:$0xf] %v591_v36 }
 0x191   :  { %v586_v37 = vpop.permute.xlu1 %585  ;;  %v338_v38 = vpop.permute.xlu0 %337 }
 0x192   :  { %v592_v39 = vsel %vm587_vm8, %v584_v34, %v586_v37  ;;  %608 = vst.msk [vmem:[#allocation2 + $0x130] sm:$0xf] %vm607_vm15, %v586_v37  ;;  %v343_v40 = vsel %vm314_vm2, %v336_v29, %v338_v38  ;;  %vm539_vm2 = vcmask 904192   ;;  %v619_v6 = vld [vmem:[#allocation2 + $0x60] sm:$0xff] }
 0x193   :  { %606 = vst [vmem:[#allocation2 + $0x128] sm:$0xf] %v592_v39  ;;  %357 = vst [vmem:[#allocation2 + $0x30] sm:$0xf] %v343_v40  ;;  %v643_v13 = vpack.c.bf16 %v619_v6, %v613_v10 }
 0x195   :  { %v482_v41 = vpop.permute.xlu1 %481  ;;  %v410_v42 = vpop.permute.xlu0 %409 }
 0x196   :  { %v489_v44 = vsel %vm485_vm9, %v480_v11, %v482_v41  ;;  %v416_v45 = vsel %vm411_vm7, %v408_v33, %v410_v42  ;;  %v637_v46 = vld [vmem:[#allocation2 + $0x120] sm:$0xf] }
 0x197   :  { %503 = vst [vmem:[#allocation2 + $0xa0] sm:$0xf0] %v489_v44  ;;  %430 = vst [vmem:[#allocation2 + $0x70] sm:$0xf] %v416_v45  ;;  %v655_v47 = vpack.c.bf16 %v637_v46, %v637_v46  ;;  %v808_v33 = vld [vmem:[%s1198_s1] sm:$0xff] }
 0x198   :  { %v814_v36 = vcombine.high %v808_v33, %v808_v33 }
 0x199   :  { %v550_v48 = vpop.permute.xlu1 %549  ;;  %877 = vmatprep.subr.msk.bf16.mxu0 %vm128_vm0, %v655_v47  ;;  %v484_v49 = vpop.permute.xlu0 %483  ;;  %v639_v51 = vld [vmem:[#allocation2 + $0x130] sm:$0xf] }
 0x19a   :  { %v557_v52 = vsel %vm553_vm11, %v548_v15, %v550_v48  ;;  %v490_v53 = vsel %vm485_vm9, %v482_v41, %v484_v49  ;;  %506 = vst.msk [vmem:[#allocation2 + $0xb0] sm:$0xf0] %vm505_vm3, %v484_v49  ;;  %737 = vmatpush1.bf16.msra.mxu0 %v674_v50  ;;  %v657_v54 = vpack.c.bf16 %v639_v51, %v639_v51  ;;  %v638_v55 = vld [vmem:[#allocation2 + $0x128] sm:$0xf] }
 0x19b   :  { %571 = vst [vmem:[#allocation2 + $0xe0] sm:$0xf0] %v557_v52  ;;  %504 = vst [vmem:[#allocation2 + $0xa8] sm:$0xf0] %v490_v53  ;;  %v656_v56 = vpack.c.bf16 %v638_v55, %v638_v55  ;;  %v810_v55 = vld [vmem:[%s1198_s1 + $0x10] sm:$0xff] }
 0x19c   :  { %879 = vmatprep.subr.msk.bf16.mxu1 %vm128_vm0, %v657_v54 }
 0x19d   :  { %v518_v57 = vpop.permute.xlu1 %517  ;;  %v552_v58 = vpop.permute.xlu0 %551  ;;  %v680_v59 = vsel %vm128_vm0, %v656_v56, 0 }
 0x19e   :  { %v524_v60 = vsel %vm519_vm4, %v1125_v24, %v518_v57  ;;  %540 = vst.msk [vmem:[#allocation2 + $0xf0] sm:$0xf] %vm539_vm2, %v518_v57  ;;  %v558_v61 = vsel %vm553_vm11, %v550_v48, %v552_v58  ;;  %778 = vmatpush1.bf16.msra.mxu1 %v680_v59  ;;  %v625_v4 = vld [vmem:[#allocation2 + $0xa0] sm:$0xff]  ;;  %v642_v24 = vpack.c.bf16 %v618_v16, %v612_v23 }
 0x19f   :  { %574 = vst.msk [vmem:[#allocation2 + $0xf0] sm:$0xf0] %vm573_vm5, %v552_v58  ;;  %538 = vst [vmem:[#allocation2 + $0xe8] sm:$0xf] %v524_v60  ;;  %v816_v60 = vcombine.high %v810_v55, %v810_v55 }
 0x1a0   :  { %572 = vst [vmem:[#allocation2 + $0xe8] sm:$0xf0] %v558_v61 }
 0x1a1   :  { %v374_v62 = vpop.permute.xlu1 %373  ;;  %v376_v63 = vpop.permute.xlu0 %375  ;;  %v627_v14 = vld [vmem:[#allocation2 + $0xb0] sm:$0xff] }
 0x1a2   :  { %v381_v1 = vsel %vm377_vm13, %v1127_v25, %v374_v62  ;;  %v382_v3 = vsel %vm377_vm13, %v374_v62, %v376_v63  ;;  %v631_v5 = vld [vmem:[#allocation2 + $0xe0] sm:$0xff]  ;;  %v626_v20 = vld [vmem:[#allocation2 + $0xa8] sm:$0xff] }
 0x1a3   :  { %395 = vst [vmem:[#allocation2 + $0x28] sm:$0xf0] %v381_v1  ;;  %396 = vst [vmem:[#allocation2 + $0x30] sm:$0xf0] %v382_v3  ;;  %v649_v7 = vpack.c.bf16 %v631_v5, %v625_v4 }
 0x1a5   :  { %v442_v11 = vpop.permute.xlu1 %441  ;;  %738 = vmatprep.subr.bf16.mxu0 %v649_v7  ;;  %v444_v12 = vpop.permute.xlu0 %443 }
 0x1a6   :  { %v633_v15 = vld [vmem:[#allocation2 + $0xf0] sm:$0xff]  ;;  %v449_v17 = vsel %vm445_vm14, %v1139_v30, %v442_v11  ;;  %v450_v18 = vsel %vm445_vm14, %v442_v11, %v444_v12  ;;  %739 = vmatpush1.bf16.msra.mxu0 %v648_v9 }
 0x1a7   :  { %v651_v19 = vpack.c.bf16 %v633_v15, %v627_v14  ;;  %v632_v21 = vld [vmem:[#allocation2 + $0xe8] sm:$0xff]  ;;  %463 = vst [vmem:[#allocation2 + $0x68] sm:$0xf0] %v449_v17  ;;  %464 = vst [vmem:[#allocation2 + $0x70] sm:$0xf0] %v450_v18  ;;  %740 = vmatprep.subr.bf16.mxu0 %v643_v13 }
 0x1a8   :  { %v650_v22 = vpack.c.bf16 %v632_v21, %v626_v20 }
 0x1a9   :  { %779 = vmatprep.subr.bf16.mxu1 %v651_v19 }
 0x1aa   :  { %780 = vmatpush1.bf16.msra.mxu1 %v650_v22  ;;  %741 = vmatpush1.bf16.msra.mxu0 %v642_v24  ;;  %v615_v25 = vld [vmem:[#allocation2 + $0x30] sm:$0xff]  ;;  %v614_v27 = vld [vmem:[#allocation2 + $0x28] sm:$0xff] }
 0x1ad   :  { %878 = vmatmul.mubr.msk.bf16.vlgmr.msra.gmra.mxu0 %vm124_vm1, %v1137_v28 }
 0x1ae   :  { %v621_v26 = vld [vmem:[#allocation2 + $0x70] sm:$0xff]  ;;  %v620_v29 = vld [vmem:[#allocation2 + $0x68] sm:$0xff] }
 0x1af   :  { %v645_v30 = vpack.c.bf16 %v621_v26, %v615_v25  ;;  %v644_v31 = vpack.c.bf16 %v620_v29, %v614_v27 }
 0x1b1   :  { %781 = vmatprep.subr.bf16.mxu1 %v645_v30 }
 0x1b2   :  { %782 = vmatpush1.bf16.msra.mxu1 %v644_v31  ;;  %v662_v32 = vpop.permute.xlu1 %661 }
 0x1b5   :  { %880 = vmatmul.mubr.msk.bf16.vlgmr.msra.gmra.mxu1 %vm124_vm1, %v1137_v28  ;;  %v809_v28 = vld [vmem:[%s1198_s1 + $0x8] sm:$0xff] }
 0x1b6   :  { %v815_v47 = vcombine.high %v809_v28, %v809_v28 }
 0x249   :  { %v719_v34 = vpop.f32.mrf.mxu1 }
 0x24a   :  { %v720_v35 = vadd.f32 %v719_v34, %v662_v32 }
 0x24b   :  { %v721_v37 = vpop.f32.mrf.mxu1 }
 0x24c   :  { %v722_v38 = vadd.f32 %v721_v37, %v662_v32  ;;  %v820_v39 = vadd.f32 %v808_v33, %v720_v35 }
 0x24d   :  { %v723_v40 = vpop.f32.mrf.mxu1 }
 0x24e   :  { %v821_v2 = vadd.f32 %v814_v36, %v722_v38  ;;  %v826_v41 = vmax.f32 %v820_v39, 0.0 }
 0x24f   :  { %v724_v42 = vpop.f32.mrf.mxu1 }
 0x250   :  { %v827_v43 = vmax.f32 %v821_v2, 0.0 }
 0x252   :  { %v838_v44 = vcombine.low %v826_v41, %v827_v43 }
 0x254   :  { %844 = vst [vmem:[%s1199_s7] sm:$0xff] %v838_v44 }
 0x26d   :  { %v760_v45 = vpop.f32.mrf.mxu0 }
 0x26e   :  { %v761_v46 = vadd.f32 %v760_v45, %v662_v32 }
 0x26f   :  { %v762_v48 = vpop.f32.mrf.mxu0 }
 0x270   :  { %v822_v49 = vadd.f32 %v809_v28, %v761_v46  ;;  %v763_v50 = vadd.f32 %v762_v48, %v662_v32 }
 0x271   :  { %v764_v51 = vpop.f32.mrf.mxu0 }
 0x272   :  { %v828_v52 = vmax.f32 %v822_v49, 0.0  ;;  %v823_v53 = vadd.f32 %v815_v47, %v763_v50 }
 0x273   :  { %v765_v54 = vpop.f32.mrf.mxu0 }
 0x274   :  { %v829_v56 = vmax.f32 %v823_v53, 0.0 }
 0x275   :  { %v801_v57 = vpop.f32.mrf.mxu1 }
 0x276   :  { %v839_v58 = vcombine.low %v828_v52, %v829_v56  ;;  %v802_v59 = vadd.f32 %v801_v57, %v662_v32 }
 0x277   :  { %v803_v61 = vpop.f32.mrf.mxu1 }
 0x278   :  { %845 = vst [vmem:[%s1199_s7 + $0x8] sm:$0xff] %v839_v58  ;;  %v824_v62 = vadd.f32 %v810_v55, %v802_v59  ;;  %v804_v63 = vadd.f32 %v803_v61, %v662_v32 }
 0x279   :  { %v805_v0 = vpop.f32.mrf.mxu1 }
 0x27a   :  { %v825_v1 = vadd.f32 %v816_v60, %v804_v63  ;;  %v830_v4 = vmax.f32 %v824_v62, 0.0 }
 0x27b   :  { %v806_v3 = vpop.f32.mrf.mxu1 }
 0x27c   :  { %v831_v5 = vmax.f32 %v825_v1, 0.0 }
 0x27e   :  { %v840_v6 = vcombine.low %v830_v4, %v831_v5 }
 0x280   :  { %846 = vst [vmem:[%s1199_s7 + $0x10] sm:$0xff] %v840_v6 }

</bundles_post_ra>
